<compile_context>
chip_gen: v7x
topology: tpu7x:2x2x1
jax: 0.10.0
libtpu: 0.0.40
codegen_flags: <defaults>
</compile_context>

<pallas_src>
import jax
import jax.numpy as jnp
from jax.experimental import pallas as pl
from jax.experimental.pallas import tpu as pltpu


def _ceil_div(a, b):
    return -(-a // b)


def _round_up(a, m):
    return _ceil_div(a, m) * m


# ---------------------------------------------------------------------------
# VMEM budget / vocab-block sizing (re-derived per generation: v5e/v6e 128 MiB,
# v7x 64 MiB physical VMEM per TensorCore).
# ---------------------------------------------------------------------------
def _vmem_budget_bytes():
    default_cap = 64 << 20                      # v7x physical VMEM per TC
    try:
        cap = int(getattr(pltpu.get_tpu_info(), "vmem_capacity_bytes",
                          default_cap))
    except Exception:
        cap = default_cap
    # 3/4 of physical, capped at 96 MiB even on 128 MiB parts (v5e / v6e).
    return int(max(32 << 20, min((cap * 3) // 4, 96 << 20)))


def _pick_block_v(vocab, units, batch, w_bytes, n_split, vmem_budget):
    """Largest lane-dense vocab block whose double-buffered tiles fit VMEM."""
    fixed = 1 << 20                                    # h1 / scratch headroom
    # per vocab lane: 2x W_out tile + 2x b_out tile + 2x logits out tile
    per_lane = 2 * (units * w_bytes + 4 + batch * 4)
    cap = max(128, min((vmem_budget - fixed) // per_lane, 16384))
    cap = (cap // 128) * 128
    per_split = _ceil_div(vocab, n_split)
    n_blocks = max(1, _ceil_div(per_split, cap))       # even split, low padding
    return int(_round_up(_ceil_div(per_split, n_blocks), 128))


# ---------------------------------------------------------------------------
# One-time parameter prep (hoisted out of the per-decode-step forward).
# ---------------------------------------------------------------------------
def prepare_params(params, *, batch, n_split=2, weight_dtype=jnp.bfloat16):
    units = params["w_hh"].shape[1]
    vocab = params["w_out"].shape[0]
    w_bytes = jnp.dtype(weight_dtype).itemsize
    budget = _vmem_budget_bytes()
    block_v = _pick_block_v(vocab, units, batch, w_bytes, n_split, budget)
    n_blocks = max(1, _ceil_div(vocab, n_split * block_v))
    vocab_pad = n_split * n_blocks * block_v

    w_out_t = params["w_out"].T.astype(weight_dtype)            # (U, V)
    b_out = params["b_out"].reshape(1, -1).astype(jnp.float32)  # (1, V)
    if vocab_pad != vocab:
        # Zero-pad W_out columns; pad b_out with -1e30 so padded logits are a
        # huge negative constant (exactly 0 contribution to the sum-exp, no NaN).
        w_out_t = jnp.pad(w_out_t, ((0, 0), (0, vocab_pad - vocab)))
        b_out = jnp.pad(b_out, ((0, 0), (0, vocab_pad - vocab)),
                        constant_values=-1e30)

    return dict(
        embed=params["embed"].astype(weight_dtype),              # (V, E)
        w_ih_t=params["w_ih"].T.astype(weight_dtype),            # (E, 4U)
        w_hh_t=params["w_hh"].T.astype(weight_dtype),            # (U, 4U)
        b_lstm=(params["b_ih"] + params["b_hh"]).reshape(1, -1)
               .astype(jnp.float32),                             # (1, 4U)
        w_out_t=w_out_t, b_out=b_out,
        units=units, vocab=vocab, vocab_pad=vocab_pad,
        block_v=block_v, n_split=n_split, n_blocks_per_split=n_blocks,
        vmem_limit=budget,
    )


# ---------------------------------------------------------------------------
# Kernel 1: LSTM cell (single grid step, tiny).  Weights arrive bf16, math f32.
# ---------------------------------------------------------------------------
def _lstm_cell_kernel(x_ref, h0_ref, c0_ref, wih_ref, whh_ref, b_ref,
                      h1_ref, c1_ref):
    u = h0_ref.shape[1]
    gates = (
        jnp.dot(x_ref[...], wih_ref[...], preferred_element_type=jnp.float32)
        + jnp.dot(h0_ref[...].astype(whh_ref.dtype), whh_ref[...],
                  preferred_element_type=jnp.float32)
        + b_ref[...]
    )
    i_g = jax.nn.sigmoid(gates[:, 0 * u:1 * u])
    f_g = jax.nn.sigmoid(gates[:, 1 * u:2 * u])
    g_g = jnp.tanh(gates[:, 2 * u:3 * u])
    o_g = jax.nn.sigmoid(gates[:, 3 * u:4 * u])
    c1 = f_g * c0_ref[...] + i_g * g_g
    h1 = o_g * jnp.tanh(c1)
    h1_ref[...] = h1.astype(h1_ref.dtype)
    c1_ref[...] = c1.astype(c1_ref.dtype)


def _lstm_cell(x, h0, c0, p):
    b, e = x.shape
    u = p["units"]
    full = lambda i: (0, 0)
    return pl.pallas_call(
        _lstm_cell_kernel,
        out_shape=(jax.ShapeDtypeStruct((b, u), jnp.float32),
                   jax.ShapeDtypeStruct((b, u), jnp.float32)),
        grid_spec=pltpu.PrefetchScalarGridSpec(
            num_scalar_prefetch=0,
            grid=(1,),
            in_specs=[
                pl.BlockSpec((b, e), full),
                pl.BlockSpec((b, u), full),
                pl.BlockSpec((b, u), full),
                pl.BlockSpec((e, 4 * u), full),
                pl.BlockSpec((u, 4 * u), full),
                pl.BlockSpec((1, 4 * u), full),
            ],
            out_specs=[pl.BlockSpec((b, u), full),
                       pl.BlockSpec((b, u), full)],
        ),
        compiler_params=pltpu.CompilerParams(
            dimension_semantics=("arbitrary",)),
    )(x, h0, c0, p["w_ih_t"], p["w_hh_t"], p["b_lstm"])


# ---------------------------------------------------------------------------
# Kernel 2: vocab sweep (logits + online logsumexp), grid = (n_split, n_blocks).
# Leading "parallel" axis shards the vocab range across TensorCores (v7x); each
# split keeps its own running (max, sum-exp) in VMEM scratch and emits one
# partial lse value.
# ---------------------------------------------------------------------------
def _vocab_sweep_kernel(h1_ref, wout_ref, bout_ref, logits_ref, lse_ref,
                        m_scr, s_scr):
    j = pl.program_id(1)
    nj = pl.num_programs(1)

    @pl.when(j == 0)
    def _():
        m_scr[...] = jnp.full_like(m_scr, -jnp.inf)
        s_scr[...] = jnp.zeros_like(s_scr)

    logit = (
        jnp.dot(h1_ref[...], wout_ref[...], preferred_element_type=jnp.float32)
        + bout_ref[...]
    )
    logits_ref[...] = logit

    m_prev = m_scr[...]
    m_new = jnp.maximum(m_prev, jnp.max(logit, axis=-1, keepdims=True))
    s_scr[...] = (s_scr[...] * jnp.exp(m_prev - m_new)
                  + jnp.sum(jnp.exp(logit - m_new), axis=-1, keepdims=True))
    m_scr[...] = m_new

    @pl.when(j == nj - 1)
    def _():
        lse_ref[...] = m_scr[...] + jnp.log(s_scr[...])


def _vocab_sweep(h1, p):
    b = h1.shape[0]
    u = p["units"]
    blk = p["block_v"]
    ns = p["n_split"]
    nj = p["n_blocks_per_split"]
    v_pad = p["vocab_pad"]
    w_out_t = p["w_out_t"]
    col = lambda s, j: (0, s * nj + j)

    return pl.pallas_call(
        _vocab_sweep_kernel,
        out_shape=(jax.ShapeDtypeStruct((b, v_pad), jnp.float32),
                   jax.ShapeDtypeStruct((ns, b, 1), jnp.float32)),
        grid_spec=pltpu.PrefetchScalarGridSpec(
            num_scalar_prefetch=0,
            grid=(ns, nj),
            in_specs=[
                pl.BlockSpec((b, u), lambda s, j: (0, 0)),       # h1 (resident)
                pl.BlockSpec((u, blk), col),                     # W_out^T block
                pl.BlockSpec((1, blk), col),                     # b_out block
            ],
            out_specs=[
                pl.BlockSpec((b, blk), col),                     # logits block
                pl.BlockSpec((None, b, 1), lambda s, j: (s, 0, 0)),  # partial lse
            ],
            scratch_shapes=[
                pltpu.VMEM((b, 1), jnp.float32),                 # running max
                pltpu.VMEM((b, 1), jnp.float32),                 # running sumexp
            ],
        ),
        compiler_params=pltpu.CompilerParams(
            dimension_semantics=("parallel", "arbitrary"),
            vmem_limit_bytes=p["vmem_limit"]),
    )(h1.astype(w_out_t.dtype), w_out_t, p["b_out"])


# ---------------------------------------------------------------------------
# Kernel 3: lane-dense log-softmax normalization.
# ---------------------------------------------------------------------------
def _normalize_kernel(logits_ref, lse_ref, out_ref):
    out_ref[...] = (logits_ref[...] - lse_ref[...]).astype(out_ref.dtype)


def _logsoftmax_normalize(logits, lse, p):
    b, v_pad = logits.shape
    blk = p["block_v"]
    if 20 * b * (blk * p["n_split"]) <= p["vmem_limit"]:
        blk = blk * p["n_split"]                 # bigger lane-dense tiles
    n = v_pad // blk
    return pl.pallas_call(
        _normalize_kernel,
        out_shape=jax.ShapeDtypeStruct((b, v_pad), jnp.float32),
        grid_spec=pltpu.PrefetchScalarGridSpec(
            num_scalar_prefetch=0,
            grid=(n,),
            in_specs=[pl.BlockSpec((b, blk), lambda j: (0, j)),
                      pl.BlockSpec((b, 1), lambda j: (0, 0))],
            out_specs=pl.BlockSpec((b, blk), lambda j: (0, j)),
        ),
        compiler_params=pltpu.CompilerParams(
            dimension_semantics=("parallel",),
            vmem_limit_bytes=p["vmem_limit"]),
    )(logits, lse)


# ---------------------------------------------------------------------------
# Full CommandDecoder.forward
# ---------------------------------------------------------------------------
def command_decoder_forward(tokens, state, prepped):
    """tokens: (B,) int; state: (h0, c0) each (B, units); prepped: from
    prepare_params().  Returns (log_probs (B, V) f32, (h1, c1) f32)."""
    h0, c0 = state
    h0 = h0.astype(jnp.float32)
    c0 = c0.astype(jnp.float32)

    # Embedding row gather: B tiny rows -> cheapest as a fused XLA gather
    # (a dedicated pallas_call costs a launch + B sub-µs DMA grid steps).
    x = jnp.take(prepped["embed"], tokens.astype(jnp.int32), axis=0)
    # TODO(synk): nn.Dropout(0.5) is identity in eval mode; training mode would
    # need pltpu.prng_seed + pltpu.stateful_bernoulli inside the LSTM kernel.

    h1, c1 = _lstm_cell(x, h0, c0, prepped)

    logits, lse_parts = _vocab_sweep(h1, prepped)
    lse = jax.scipy.special.logsumexp(lse_parts, axis=0)   # (B, 1) tiny epilogue
    log_probs = _logsoftmax_normalize(logits, lse, prepped)
    return log_probs[:, :prepped["vocab"]], (h1, c1)


# ---------------------------------------------------------------------------
# Pure-JAX reference (torch LSTMCell gate order i, f, g, o), computed in f32
# from the same bf16-rounded weight values, HIGHEST matmul precision.
# ---------------------------------------------------------------------------
def reference_forward(tokens, h0, c0, params, weight_dtype):
    hi = jax.lax.Precision.HIGHEST
    f32 = jnp.float32
    emb = params["embed"].astype(weight_dtype).astype(f32)
    w_ih = params["w_ih"].astype(weight_dtype).astype(f32)
    w_hh = params["w_hh"].astype(weight_dtype).astype(f32)
    w_out = params["w_out"].astype(weight_dtype).astype(f32)
    x = emb[tokens]
    gates = (jnp.dot(x, w_ih.T, precision=hi) + params["b_ih"]
             + jnp.dot(h0, w_hh.T, precision=hi) + params["b_hh"])
    i, f, g, o = jnp.split(gates, 4, axis=1)
    i = jax.nn.sigmoid(i)
    f = jax.nn.sigmoid(f)
    g = jnp.tanh(g)
    o = jax.nn.sigmoid(o)
    c1 = f * c0 + i * g
    h1 = o * jnp.tanh(c1)
    logits = jnp.dot(h1, w_out.T, precision=hi) + params["b_out"]
    return jax.nn.log_softmax(logits, axis=1), h1, c1


if __name__ == "__main__":
    key = jax.random.PRNGKey(0)
    ks = jax.random.split(key, 10)

    # Small shapes; V=520 is deliberately NOT a multiple of 128 to exercise the
    # vocab padding / -1e30 masking path.
    B, V, E, U = 8, 520, 128, 128

    tokens = jax.random.randint(ks[0], (B,), 0, V, dtype=jnp.int32)
    params = {
        "embed": jax.random.uniform(ks[1], (V, E), jnp.float32, -0.05, 0.05),
        "w_ih": jax.random.normal(ks[2], (4 * U, E), jnp.float32) * 0.05,
        "w_hh": jax.random.normal(ks[3], (4 * U, U), jnp.float32) * 0.05,
        "b_ih": jax.random.normal(ks[4], (4 * U,), jnp.float32) * 0.01,
        "b_hh": jax.random.normal(ks[5], (4 * U,), jnp.float32) * 0.01,
        "w_out": jax.random.normal(ks[6], (V, U), jnp.float32) * 0.05,
        "b_out": jax.random.normal(ks[7], (V,), jnp.float32) * 0.01,
    }
    h0 = jax.random.normal(ks[8], (B, U), jnp.float32) * 0.1
    c0 = jax.random.normal(ks[9], (B, U), jnp.float32) * 0.1

    prepped = prepare_params(params, batch=B)   # one-time model-load prep
    log_probs, (h1, c1) = command_decoder_forward(tokens, (h0, c0), prepped)
    log_probs = jax.block_until_ready(log_probs)

    ref_lp, ref_h1, ref_c1 = reference_forward(tokens, h0, c0, params,
                                               jnp.bfloat16)
    assert log_probs.shape == (B, V), log_probs.shape
    assert jnp.allclose(log_probs, ref_lp, atol=5e-3, rtol=5e-3), (
        "log_probs mismatch", float(jnp.max(jnp.abs(log_probs - ref_lp))))
    assert jnp.allclose(h1, ref_h1, atol=2e-3, rtol=2e-3), (
        "h1 mismatch", float(jnp.max(jnp.abs(h1 - ref_h1))))
    assert jnp.allclose(c1, ref_c1, atol=2e-3, rtol=2e-3), (
        "c1 mismatch", float(jnp.max(jnp.abs(c1 - ref_c1))))

    print("KERNEL_OK")
</pallas_src>

<mosaic_0001>
module attributes {stable_mosaic.version = 11 : i64} {
  func.func @_lstm_cell_kernel(%arg0: i32, %arg1: memref<8x128xbf16, #tpu.memory_space<vmem>>, %arg2: memref<8x128xf32, #tpu.memory_space<vmem>>, %arg3: memref<8x128xf32, #tpu.memory_space<vmem>>, %arg4: memref<128x512xbf16, #tpu.memory_space<vmem>>, %arg5: memref<128x512xbf16, #tpu.memory_space<vmem>>, %arg6: memref<1x512xf32, #tpu.memory_space<vmem>>, %arg7: memref<8x128xf32, #tpu.memory_space<vmem>>, %arg8: memref<8x128xf32, #tpu.memory_space<vmem>>) attributes {dimension_semantics = [#tpu.dimension_semantics<arbitrary>], iteration_bounds = array<i64: 1>, scalar_prefetch = 0 : i64, scratch_operands = 0 : i64, tpu.core_type = #tpu.core_type<tc>, window_params = [{pipeline_mode = #tpu.pipeline_mode<synchronous>, transform_indices = @transform_0, window_bounds = array<i64: 8, 128>}, {pipeline_mode = #tpu.pipeline_mode<synchronous>, transform_indices = @transform_1, window_bounds = array<i64: 8, 128>}, {pipeline_mode = #tpu.pipeline_mode<synchronous>, transform_indices = @transform_2, window_bounds = array<i64: 8, 128>}, {pipeline_mode = #tpu.pipeline_mode<synchronous>, transform_indices = @transform_3, window_bounds = array<i64: 128, 512>}, {pipeline_mode = #tpu.pipeline_mode<synchronous>, transform_indices = @transform_4, window_bounds = array<i64: 128, 512>}, {pipeline_mode = #tpu.pipeline_mode<synchronous>, transform_indices = @transform_5, window_bounds = array<i64: 1, 512>}, {pipeline_mode = #tpu.pipeline_mode<synchronous>, transform_indices = @transform_6, window_bounds = array<i64: 8, 128>}, {pipeline_mode = #tpu.pipeline_mode<synchronous>, transform_indices = @transform_7, window_bounds = array<i64: 8, 128>}]} {
    %c0 = arith.constant 0 : index
    %c0_0 = arith.constant 0 : index
    %0 = vector.load %arg1[%c0, %c0_0] : memref<8x128xbf16, #tpu.memory_space<vmem>>, vector<8x128xbf16>
    %c0_1 = arith.constant 0 : index
    %c0_2 = arith.constant 0 : index
    %1 = vector.load %arg4[%c0_1, %c0_2] : memref<128x512xbf16, #tpu.memory_space<vmem>>, vector<128x512xbf16>
    %cst = arith.constant dense<0.000000e+00> : vector<8x512xf32>
    %2 = tpu.matmul %0, %1, %cst {dimension_numbers = #tpu.dot_dimension_numbers<[1], [0], [0], [1], [0, 0, 1, 1], [], []>} : vector<8x128xbf16>, vector<128x512xbf16>, vector<8x512xf32> -> vector<8x512xf32>
    %c0_3 = arith.constant 0 : index
    %c0_4 = arith.constant 0 : index
    %3 = vector.load %arg2[%c0_3, %c0_4] : memref<8x128xf32, #tpu.memory_space<vmem>>, vector<8x128xf32>
    %4 = arith.truncf %3 : vector<8x128xf32> to vector<8x128xbf16>
    %c0_5 = arith.constant 0 : index
    %c0_6 = arith.constant 0 : index
    %5 = vector.load %arg5[%c0_5, %c0_6] : memref<128x512xbf16, #tpu.memory_space<vmem>>, vector<128x512xbf16>
    %cst_7 = arith.constant dense<0.000000e+00> : vector<8x512xf32>
    %6 = tpu.matmul %4, %5, %cst_7 {dimension_numbers = #tpu.dot_dimension_numbers<[1], [0], [0], [1], [0, 0, 1, 1], [], []>} : vector<8x128xbf16>, vector<128x512xbf16>, vector<8x512xf32> -> vector<8x512xf32>
    %7 = arith.addf %2, %6 : vector<8x512xf32>
    %c0_8 = arith.constant 0 : index
    %c0_9 = arith.constant 0 : index
    %8 = vector.load %arg6[%c0_8, %c0_9] : memref<1x512xf32, #tpu.memory_space<vmem>>, vector<1x512xf32>
    %9 = vector.broadcast %8 : vector<1x512xf32> to vector<8x512xf32>
    %10 = arith.addf %7, %9 : vector<8x512xf32>
    %11 = vector.extract_strided_slice %10 {offsets = [0, 0], sizes = [8, 128], strides = [1, 1]} : vector<8x512xf32> to vector<8x128xf32>
    %12 = arith.negf %11 : vector<8x128xf32>
    %13 = math.exp %12 : vector<8x128xf32>
    %cst_10 = arith.constant 1.000000e+00 : f32
    %14 = vector.broadcast %cst_10 : f32 to vector<8x128xf32>
    %15 = arith.addf %14, %13 : vector<8x128xf32>
    %16 = arith.divf %14, %15 : vector<8x128xf32>
    %17 = vector.extract_strided_slice %10 {offsets = [0, 128], sizes = [8, 128], strides = [1, 1]} : vector<8x512xf32> to vector<8x128xf32>
    %18 = arith.negf %17 : vector<8x128xf32>
    %19 = math.exp %18 : vector<8x128xf32>
    %cst_11 = arith.constant 1.000000e+00 : f32
    %20 = vector.broadcast %cst_11 : f32 to vector<8x128xf32>
    %21 = arith.addf %20, %19 : vector<8x128xf32>
    %22 = arith.divf %20, %21 : vector<8x128xf32>
    %23 = vector.extract_strided_slice %10 {offsets = [0, 256], sizes = [8, 128], strides = [1, 1]} : vector<8x512xf32> to vector<8x128xf32>
    %24 = math.tanh %23 : vector<8x128xf32>
    %25 = vector.extract_strided_slice %10 {offsets = [0, 384], sizes = [8, 128], strides = [1, 1]} : vector<8x512xf32> to vector<8x128xf32>
    %26 = arith.negf %25 : vector<8x128xf32>
    %27 = math.exp %26 : vector<8x128xf32>
    %cst_12 = arith.constant 1.000000e+00 : f32
    %28 = vector.broadcast %cst_12 : f32 to vector<8x128xf32>
    %29 = arith.addf %28, %27 : vector<8x128xf32>
    %30 = arith.divf %28, %29 : vector<8x128xf32>
    %c0_13 = arith.constant 0 : index
    %c0_14 = arith.constant 0 : index
    %31 = vector.load %arg3[%c0_13, %c0_14] : memref<8x128xf32, #tpu.memory_space<vmem>>, vector<8x128xf32>
    %32 = arith.mulf %22, %31 : vector<8x128xf32>
    %33 = arith.mulf %16, %24 : vector<8x128xf32>
    %34 = arith.addf %32, %33 : vector<8x128xf32>
    %35 = math.tanh %34 : vector<8x128xf32>
    %36 = arith.mulf %30, %35 : vector<8x128xf32>
    %c0_15 = arith.constant 0 : index
    %c0_16 = arith.constant 0 : index
    %37 = vector.load %arg7[%c0_15, %c0_16] : memref<8x128xf32, #tpu.memory_space<vmem>>, vector<8x128xf32>
    tpu.vector_store %arg7[%c0_15, %c0_16], %36 {strides = array<i32>} : memref<8x128xf32, #tpu.memory_space<vmem>>, vector<8x128xf32>,
    %c0_17 = arith.constant 0 : index
    %c0_18 = arith.constant 0 : index
    %38 = vector.load %arg8[%c0_17, %c0_18] : memref<8x128xf32, #tpu.memory_space<vmem>>, vector<8x128xf32>
    tpu.vector_store %arg8[%c0_17, %c0_18], %34 {strides = array<i32>} : memref<8x128xf32, #tpu.memory_space<vmem>>, vector<8x128xf32>,
    return
  }
  func.func @transform_0(%arg0: i32) -> (i32, i32) {
    %c0_i32 = arith.constant 0 : i32
    %c0_i32_0 = arith.constant 0 : i32
    %c0_i32_1 = arith.constant 0 : i32
    return %c0_i32, %c0_i32_0 : i32, i32
  }
  func.func @transform_1(%arg0: i32) -> (i32, i32) {
    %c0_i32 = arith.constant 0 : i32
    %c0_i32_0 = arith.constant 0 : i32
    %c0_i32_1 = arith.constant 0 : i32
    return %c0_i32, %c0_i32_0 : i32, i32
  }
  func.func @transform_2(%arg0: i32) -> (i32, i32) {
    %c0_i32 = arith.constant 0 : i32
    %c0_i32_0 = arith.constant 0 : i32
    %c0_i32_1 = arith.constant 0 : i32
    return %c0_i32, %c0_i32_0 : i32, i32
  }
  func.func @transform_3(%arg0: i32) -> (i32, i32) {
    %c0_i32 = arith.constant 0 : i32
    %c0_i32_0 = arith.constant 0 : i32
    %c0_i32_1 = arith.constant 0 : i32
    return %c0_i32, %c0_i32_0 : i32, i32
  }
  func.func @transform_4(%arg0: i32) -> (i32, i32) {
    %c0_i32 = arith.constant 0 : i32
    %c0_i32_0 = arith.constant 0 : i32
    %c0_i32_1 = arith.constant 0 : i32
    return %c0_i32, %c0_i32_0 : i32, i32
  }
  func.func @transform_5(%arg0: i32) -> (i32, i32) {
    %c0_i32 = arith.constant 0 : i32
    %c0_i32_0 = arith.constant 0 : i32
    %c0_i32_1 = arith.constant 0 : i32
    return %c0_i32, %c0_i32_0 : i32, i32
  }
  func.func @transform_6(%arg0: i32) -> (i32, i32) {
    %c0_i32 = arith.constant 0 : i32
    %c0_i32_0 = arith.constant 0 : i32
    %c0_i32_1 = arith.constant 0 : i32
    return %c0_i32, %c0_i32_0 : i32, i32
  }
  func.func @transform_7(%arg0: i32) -> (i32, i32) {
    %c0_i32 = arith.constant 0 : i32
    %c0_i32_0 = arith.constant 0 : i32
    %c0_i32_1 = arith.constant 0 : i32
    return %c0_i32, %c0_i32_0 : i32, i32
  }
}

</mosaic_0001>

<bundles_post_ra>
// kernel: tpu_custom_call.1
= control target key start
LH: loop header
LB: loop body
LE: loop exit
PB: predicated region body
PF: predicated region fallthrough
CT: control target
= control target key end

     0   :  { %13 = vsyncpa [#allocation3], 0  ;;  %s1232_s0 = inlined_call_operand.hbm [shape: bf16[8,128], index: 0, kind: input, shape index: {}]   ;;  %s1233_s1 = inlined_call_operand.hbm [shape: f32[8,128], index: 1, kind: input, shape index: {}]   ;;  %s1234_s2 = inlined_call_operand.hbm [shape: f32[8,128], index: 2, kind: input, shape index: {}]   ;;  %s1235_s3 = inlined_call_operand.hbm [shape: bf16[128,512], index: 3, kind: input, shape index: {}]   ;;  %s1236_s4 = inlined_call_operand.hbm [shape: bf16[128,512], index: 4, kind: input, shape index: {}]   ;;  %s1237_s5 = inlined_call_operand.vmem [shape: f32[1,512], index: 5, kind: input, shape index: {}]   ;;  %s1238_s6 = inlined_call_operand.hbm [shape: f32[8,128], index: 6, kind: output, shape index: {0}]   ;;  %s1239_s7 = inlined_call_operand.hbm [shape: f32[8,128], index: 7, kind: output, shape index: {1}]  }
   0x1   :  { %14 = vsyncpa [#allocation6], 0 }
   0x2   :  { %15 = vsyncpa [#allocation9], 0 }
   0x3   :  { %16 = vsyncpa [#allocation4], 0 }
   0x4   :  { %17 = vsyncpa [#allocation13], 0  ;;  %s1078_s24 = smov [#allocation5]   ;;  %s1079_s26 = smov [#allocation8]  }
   0x5   :  { %s34_s25 = sshll.u32 %s1078_s24, 4  ;;  %s53_s27 = sshll.u32 %s1079_s26, 4  ;;  %s35_s25 = int_to_ptr.vmem [resolvable:$true] %s34_s25  ;;  %s1128_s27 = int_to_ptr.vmem [resolvable:$true] %s53_s27 }
   0x6   :  { %s914_s30 = scalar_lea.hbm %s1233_s1, 128 }
   0x7   :  { %p915_p0 = scmp.ne.s32.totalorder %s1233_s1, %s914_s30  ;;  %p918_p1 = scmp.lt.u32.totalorder %s914_s30, %s1233_s1 }
   0x9   :  { %p920_p2 = pnand %p918_p1, %p915_p0 }
   0xb   :  { %923 = shalt.err (!%p920_p2)
}
   0xc   :  { %s924_s12 = scalar_lea.vmem %s35_s25, 128  ;;  %p929_p4 = scmp.lt.s32.totalorder %s35_s25, %s35_s25 }
   0xd   :  { %p925_p3 = scmp.ne.s32.totalorder %s35_s25, %s924_s12  ;;  %p930_p5 = scmp.lt.s32.totalorder %s924_s12, %s924_s12 }
   0xf   :  { %p931_p6 = por %p930_p5, %p929_p4 }
  0x11   :  { %p932_p7 = pnand %p931_p6, %p925_p3 }
  0x13   :  { %935 = shalt.err (!%p932_p7)
}
  0x14   :  { %37 = dma.hbm_to_vmem [thread:$0]  %s1233_s1, 128, %s35_s25, [#allocation6]  }
  0x15   :  { %s936_s17 = scalar_lea.hbm %s1235_s3, 4096 }
  0x16   :  { %p937_p8 = scmp.ne.s32.totalorder %s1235_s3, %s936_s17  ;;  %p940_p9 = scmp.lt.u32.totalorder %s936_s17, %s1235_s3 }
  0x18   :  { %p942_p10 = pnand %p940_p9, %p937_p8 }
  0x1a   :  { %945 = shalt.err (!%p942_p10)
}
  0x1b   :  { %s946_s22 = scalar_lea.vmem %s1128_s27, 4096  ;;  %p951_p12 = scmp.lt.s32.totalorder %s1128_s27, %s1128_s27 }
  0x1c   :  { %p947_p11 = scmp.ne.s32.totalorder %s1128_s27, %s946_s22  ;;  %p952_p13 = scmp.lt.s32.totalorder %s946_s22, %s946_s22 }
  0x1e   :  { %p953_p0 = por %p952_p13, %p951_p12 }
  0x20   :  { %p954_p1 = pnand %p953_p0, %p947_p11 }
  0x22   :  { %957 = shalt.err (!%p954_p1)
}
  0x23   :  { %s1080_s1 = smov 256   ;;  %s1081_s23 = smov 16  }
  0x24   :  { %59 = dma.hbm_to_vmem [thread:$0]  %s1235_s3, 4096, %s1128_s27, [#allocation9], %s1080_s1, %s1080_s1, %s1081_s23  }
  0x25   :  { %s1082_s26 = smov [#allocation2]   ;;  %s1083_s29 = smov [#allocation7]  }
  0x26   :  { %s24_s28 = sshll.u32 %s1082_s26, 4  ;;  %s44_s30 = sshll.u32 %s1083_s29, 4  ;;  %s25_s28 = int_to_ptr.vmem [resolvable:$true] %s24_s28  ;;  %s45_s30 = int_to_ptr.vmem [resolvable:$true] %s44_s30 }
  0x27   :  { %s958_s10 = scalar_lea.hbm %s1232_s0, 64 }
  0x28   :  { %p959_p2 = scmp.ne.s32.totalorder %s1232_s0, %s958_s10  ;;  %p962_p3 = scmp.lt.u32.totalorder %s958_s10, %s1232_s0 }
  0x2a   :  { %p964_p4 = pnand %p962_p3, %p959_p2 }
  0x2c   :  { %967 = shalt.err (!%p964_p4)
}
  0x2d   :  { %s968_s3 = scalar_lea.vmem %s25_s28, 64  ;;  %p973_p6 = scmp.lt.s32.totalorder %s25_s28, %s25_s28 }
  0x2e   :  { %p969_p5 = scmp.ne.s32.totalorder %s25_s28, %s968_s3  ;;  %p974_p7 = scmp.lt.s32.totalorder %s968_s3, %s968_s3 }
  0x30   :  { %p975_p8 = por %p974_p7, %p973_p6 }
  0x32   :  { %p976_p9 = pnand %p975_p8, %p969_p5 }
  0x34   :  { %979 = shalt.err (!%p976_p9)
}
  0x35   :  { %27 = dma.hbm_to_vmem [thread:$0]  %s1232_s0, 64, %s25_s28, [#allocation3]  }
  0x36   :  { %s980_s18 = scalar_lea.hbm %s1234_s2, 128 }
  0x37   :  { %p981_p10 = scmp.ne.s32.totalorder %s1234_s2, %s980_s18  ;;  %p984_p11 = scmp.lt.u32.totalorder %s980_s18, %s1234_s2 }
  0x39   :  { %p986_p12 = pnand %p984_p11, %p981_p10 }
  0x3b   :  { %989 = shalt.err (!%p986_p12)
}
  0x3c   :  { %s990_s24 = scalar_lea.vmem %s45_s30, 128  ;;  %p995_p0 = scmp.lt.s32.totalorder %s45_s30, %s45_s30 }
  0x3d   :  { %p991_p13 = scmp.ne.s32.totalorder %s45_s30, %s990_s24  ;;  %p996_p1 = scmp.lt.s32.totalorder %s990_s24, %s990_s24 }
  0x3f   :  { %p997_p2 = por %p996_p1, %p995_p0 }
  0x41   :  { %p998_p3 = pnand %p997_p2, %p991_p13 }
  0x43   :  { %1001 = shalt.err (!%p998_p3)
}
  0x44   :  { %47 = dma.hbm_to_vmem [thread:$0]  %s1234_s2, 128, %s45_s30, [#allocation6]  }
  0x45   :  { %s1084_s26 = smov [#allocation10]   ;;  %s1002_s9 = scalar_lea.hbm %s1236_s4, 4096 }
  0x46   :  { %s65_s28 = sshll.u32 %s1084_s26, 4  ;;  %p1003_p4 = scmp.ne.s32.totalorder %s1236_s4, %s1002_s9  ;;  %s66_s28 = int_to_ptr.vmem [resolvable:$true] %s65_s28 }
  0x47   :  { %p1006_p5 = scmp.lt.u32.totalorder %s1002_s9, %s1236_s4 }
  0x49   :  { %p1008_p6 = pnand %p1006_p5, %p1003_p4 }
  0x4b   :  { %1011 = shalt.err (!%p1008_p6)
}
  0x4c   :  { %s1012_s14 = scalar_lea.vmem %s66_s28, 4096  ;;  %p1017_p8 = scmp.lt.s32.totalorder %s66_s28, %s66_s28 }
  0x4d   :  { %p1013_p7 = scmp.ne.s32.totalorder %s66_s28, %s1012_s14  ;;  %p1018_p9 = scmp.lt.s32.totalorder %s1012_s14, %s1012_s14 }
  0x4f   :  { %p1019_p10 = por %p1018_p9, %p1017_p8 }
  0x51   :  { %p1020_p11 = pnand %p1019_p10, %p1013_p7 }
  0x53   :  { %1023 = shalt.err (!%p1020_p11)
}
  0x54   :  { %71 = dma.hbm_to_vmem [thread:$0]  %s1236_s4, 4096, %s66_s28, [#allocation9], %s1080_s1, %s1080_s1, %s1081_s23  }
  0x55   :  { %1068 = dma.done.wait [#allocation3], 64  }
  0x56   :  { %1069 = vsyncadd [#allocation3], 4294967232 }
  0x57   :  { %1070 = dma.done.wait [#allocation6], 256  }
  0x58   :  { %1071 = vsyncadd [#allocation6], 4294967040 }
  0x59   :  { %1072 = dma.done.wait [#allocation9], 8192  }
  0x5a   :  { %1073 = vsyncadd [#allocation9], 4294959104  ;;  %v1085_v0 = vmov 0   ;;  %v802_v1 = vld [vmem:[#allocation10 + $0x4] ss:$16 sps:$4 sm:$0xff]  }
  0x5b   :  { %349 = vmatprep.mubr.bf16.mxu0 %v1085_v0  ;;  %390 = vmatprep.mubr.bf16.mxu1 %v1085_v0  ;;  %v804_v2 = vld [vmem:[#allocation10 + $0xc] ss:$16 sps:$4 sm:$0xff]   ;;  %v806_v3 = vld [vmem:[#allocation10] ss:$16 sps:$4 sm:$0xff]   ;;  %v807_v4 = vld [vmem:[#allocation10 + $0x8] ss:$16 sps:$4 sm:$0xff]  }
  0x5c   :  { %317 = vmatprep.subr.bf16.mxu0 %v802_v1  ;;  %358 = vmatprep.subr.bf16.mxu1 %v804_v2  ;;  %v808_v5 = vld [vmem:[#allocation10 + $0x24] ss:$16 sps:$4 sm:$0xff]   ;;  %v810_v6 = vld [vmem:[#allocation10 + $0x2c] ss:$16 sps:$4 sm:$0xff]   ;;  %v812_v7 = vld [vmem:[#allocation10 + $0x20] ss:$16 sps:$4 sm:$0xff]  }
  0x5d   :  { %318 = vmatpush1.bf16.msra.mxu0 %v806_v3  ;;  %359 = vmatpush1.bf16.msra.mxu1 %v807_v4  ;;  %v813_v8 = vld [vmem:[#allocation10 + $0x28] ss:$16 sps:$4 sm:$0xff]   ;;  %v814_v9 = vld [vmem:[#allocation10 + $0x44] ss:$16 sps:$4 sm:$0xff]   ;;  %v816_v10 = vld [vmem:[#allocation10 + $0x4c] ss:$16 sps:$4 sm:$0xff]  }
  0x5e   :  { %319 = vmatprep.subr.bf16.mxu0 %v808_v5  ;;  %360 = vmatprep.subr.bf16.mxu1 %v810_v6  ;;  %v818_v11 = vld [vmem:[#allocation10 + $0x40] ss:$16 sps:$4 sm:$0xff]   ;;  %v819_v12 = vld [vmem:[#allocation10 + $0x48] ss:$16 sps:$4 sm:$0xff]   ;;  %v820_v13 = vld [vmem:[#allocation10 + $0x64] ss:$16 sps:$4 sm:$0xff]  }
  0x5f   :  { %v822_v14 = vld [vmem:[#allocation10 + $0x6c] ss:$16 sps:$4 sm:$0xff]   ;;  %v824_v15 = vld [vmem:[#allocation10 + $0x60] ss:$16 sps:$4 sm:$0xff]   ;;  %v825_v16 = vld [vmem:[#allocation10 + $0x68] ss:$16 sps:$4 sm:$0xff]  }
  0x60   :  { %v826_v17 = vld [vmem:[#allocation10 + $0x84] ss:$16 sps:$4 sm:$0xff]   ;;  %v828_v18 = vld [vmem:[#allocation10 + $0x8c] ss:$16 sps:$4 sm:$0xff]   ;;  %v830_v19 = vld [vmem:[#allocation10 + $0x80] ss:$16 sps:$4 sm:$0xff]  }
  0x61   :  { %320 = vmatpush1.bf16.msra.mxu0 %v812_v7  ;;  %361 = vmatpush1.bf16.msra.mxu1 %v813_v8  ;;  %v831_v20 = vld [vmem:[#allocation10 + $0x88] ss:$16 sps:$4 sm:$0xff]   ;;  %v832_v21 = vld [vmem:[#allocation10 + $0xa4] ss:$16 sps:$4 sm:$0xff]   ;;  %v834_v22 = vld [vmem:[#allocation10 + $0xac] ss:$16 sps:$4 sm:$0xff]  }
  0x62   :  { %321 = vmatprep.subr.bf16.mxu0 %v814_v9  ;;  %362 = vmatprep.subr.bf16.mxu1 %v816_v10  ;;  %v836_v23 = vld [vmem:[#allocation10 + $0xa0] ss:$16 sps:$4 sm:$0xff]   ;;  %v837_v24 = vld [vmem:[#allocation10 + $0xa8] ss:$16 sps:$4 sm:$0xff]   ;;  %v838_v25 = vld [vmem:[#allocation10 + $0xc4] ss:$16 sps:$4 sm:$0xff]  }
  0x63   :  { %v840_v26 = vld [vmem:[#allocation10 + $0xcc] ss:$16 sps:$4 sm:$0xff]   ;;  %v842_v27 = vld [vmem:[#allocation10 + $0xc0] ss:$16 sps:$4 sm:$0xff]   ;;  %v843_v28 = vld [vmem:[#allocation10 + $0xc8] ss:$16 sps:$4 sm:$0xff]  }
  0x64   :  { %v844_v29 = vld [vmem:[#allocation10 + $0xe4] ss:$16 sps:$4 sm:$0xff]   ;;  %v846_v30 = vld [vmem:[#allocation10 + $0xec] ss:$16 sps:$4 sm:$0xff]   ;;  %v848_v31 = vld [vmem:[#allocation10 + $0xe0] ss:$16 sps:$4 sm:$0xff]  }
  0x65   :  { %322 = vmatpush1.bf16.msra.mxu0 %v818_v11  ;;  %363 = vmatpush1.bf16.msra.mxu1 %v819_v12  ;;  %v849_v32 = vld [vmem:[#allocation10 + $0xe8] ss:$16 sps:$4 sm:$0xff]   ;;  %v123_v33 = vld [vmem:[#allocation5] sm:$0xff]  ;;  %v855_v35 = vld [vmem:[#allocation8 + $0xc] ss:$16 sps:$4 sm:$0xff]   ;;  %v643_v12 = vlaneseq }
  0x66   :  { %323 = vmatprep.subr.bf16.mxu0 %v820_v13  ;;  %364 = vmatprep.subr.bf16.mxu1 %v822_v14  ;;  %v852_v34 = vld [vmem:[#allocation8 + $0x4] ss:$16 sps:$4 sm:$0xff]   ;;  %v124_v36 = vpack.c.bf16 %v123_v33, %v123_v33  ;;  %v850_v37 = vld [vmem:[#allocation8] ss:$16 sps:$4 sm:$0xff]   ;;  %v853_v38 = vld [vmem:[#allocation8 + $0x8] ss:$16 sps:$4 sm:$0xff]  }
  0x67   :  { %v858_v39 = vld [vmem:[#allocation8 + $0x24] ss:$16 sps:$4 sm:$0xff]   ;;  %v861_v40 = vld [vmem:[#allocation8 + $0x2c] ss:$16 sps:$4 sm:$0xff]   ;;  %v856_v41 = vld [vmem:[#allocation8 + $0x20] ss:$16 sps:$4 sm:$0xff]  }
  0x68   :  { %v859_v42 = vld [vmem:[#allocation8 + $0x28] ss:$16 sps:$4 sm:$0xff]   ;;  %v864_v43 = vld [vmem:[#allocation8 + $0x44] ss:$16 sps:$4 sm:$0xff]   ;;  %v867_v44 = vld [vmem:[#allocation8 + $0x4c] ss:$16 sps:$4 sm:$0xff]  }
  0x69   :  { %324 = vmatpush1.bf16.msra.mxu0 %v824_v15  ;;  %365 = vmatpush1.bf16.msra.mxu1 %v825_v16  ;;  %v862_v45 = vld [vmem:[#allocation8 + $0x40] ss:$16 sps:$4 sm:$0xff]   ;;  %v865_v46 = vld [vmem:[#allocation8 + $0x48] ss:$16 sps:$4 sm:$0xff]   ;;  %v870_v47 = vld [vmem:[#allocation8 + $0x64] ss:$16 sps:$4 sm:$0xff]  }
  0x6a   :  { %325 = vmatprep.subr.bf16.mxu0 %v826_v17  ;;  %366 = vmatprep.subr.bf16.mxu1 %v828_v18  ;;  %v873_v48 = vld [vmem:[#allocation8 + $0x6c] ss:$16 sps:$4 sm:$0xff]   ;;  %v868_v49 = vld [vmem:[#allocation8 + $0x60] ss:$16 sps:$4 sm:$0xff]   ;;  %v871_v50 = vld [vmem:[#allocation8 + $0x68] ss:$16 sps:$4 sm:$0xff]  }
  0x6b   :  { %v876_v51 = vld [vmem:[#allocation8 + $0x84] ss:$16 sps:$4 sm:$0xff]   ;;  %v879_v52 = vld [vmem:[#allocation8 + $0x8c] ss:$16 sps:$4 sm:$0xff]   ;;  %v874_v53 = vld [vmem:[#allocation8 + $0x80] ss:$16 sps:$4 sm:$0xff]  }
  0x6c   :  { %v877_v54 = vld [vmem:[#allocation8 + $0x88] ss:$16 sps:$4 sm:$0xff]   ;;  %v882_v55 = vld [vmem:[#allocation8 + $0xa4] ss:$16 sps:$4 sm:$0xff]   ;;  %v885_v56 = vld [vmem:[#allocation8 + $0xac] ss:$16 sps:$4 sm:$0xff]  }
  0x6d   :  { %326 = vmatpush1.bf16.msra.mxu0 %v830_v19  ;;  %367 = vmatpush1.bf16.msra.mxu1 %v831_v20  ;;  %v880_v57 = vld [vmem:[#allocation8 + $0xa0] ss:$16 sps:$4 sm:$0xff]   ;;  %v883_v58 = vld [vmem:[#allocation8 + $0xa8] ss:$16 sps:$4 sm:$0xff]   ;;  %v888_v59 = vld [vmem:[#allocation8 + $0xc4] ss:$16 sps:$4 sm:$0xff]  }
  0x6e   :  { %327 = vmatprep.subr.bf16.mxu0 %v832_v21  ;;  %368 = vmatprep.subr.bf16.mxu1 %v834_v22  ;;  %v891_v60 = vld [vmem:[#allocation8 + $0xcc] ss:$16 sps:$4 sm:$0xff]   ;;  %v886_v61 = vld [vmem:[#allocation8 + $0xc0] ss:$16 sps:$4 sm:$0xff]   ;;  %v889_v62 = vld [vmem:[#allocation8 + $0xc8] ss:$16 sps:$4 sm:$0xff]  }
  0x6f   :  { %v894_v63 = vld [vmem:[#allocation8 + $0xe4] ss:$16 sps:$4 sm:$0xff]   ;;  %v892_v1 = vld [vmem:[#allocation8 + $0xe0] ss:$16 sps:$4 sm:$0xff]   ;;  %v895_v2 = vld [vmem:[#allocation8 + $0xe8] ss:$16 sps:$4 sm:$0xff]  }
  0x70   :  { %v90_v3 = vld [vmem:[#allocation2] sm:$0xf]  ;;  %v644_v13 = vshrl.u32 %v643_v12, 7 }
  0x71   :  { %328 = vmatpush1.bf16.msra.mxu0 %v836_v23  ;;  %369 = vmatpush1.bf16.msra.mxu1 %v837_v24  ;;  %v641_v15 = vld [vmem:[%s1237_s5] sm:$0xf]  ;;  %s1086_s5 = smov [#allocation12]  }
  0x72   :  { %329 = vmatprep.subr.bf16.mxu0 %v838_v25  ;;  %370 = vmatprep.subr.bf16.mxu1 %v840_v26  ;;  %v645_v14 = vsub.s32 0, %v644_v13  ;;  %v649_v16 = vsub.s32 1, %v644_v13  ;;  %s710_s23 = sshll.u32 %s1086_s5, 4  ;;  %s711_s23 = int_to_ptr.vmem [resolvable:$true] %s710_s23 }
  0x73   :  { %s1024_s3 = scalar_lea.vmem %s711_s23, 128  ;;  %p1029_p13 = scmp.lt.s32.totalorder %s711_s23, %s711_s23 }
  0x74   :  { %v646_v17 = vrot.slane %v641_v15, %v645_v14  ;;  %v650_v20 = vrot.slane %v641_v15, %v649_v16  ;;  %p1025_p12 = scmp.ne.s32.totalorder %s711_s23, %s1024_s3  ;;  %p1030_p0 = scmp.lt.s32.totalorder %s1024_s3, %s1024_s3 }
  0x75   :  { %330 = vmatpush1.bf16.msra.mxu0 %v842_v27  ;;  %371 = vmatpush1.bf16.msra.mxu1 %v843_v28  ;;  %v657_v27 = vsub.s32 3, %v644_v13 }
  0x76   :  { %331 = vmatprep.subr.bf16.mxu0 %v844_v29  ;;  %372 = vmatprep.subr.bf16.mxu1 %v846_v30  ;;  %p1031_p1 = por %p1030_p0, %p1029_p13 }
  0x78   :  { %p1032_p2 = pnand %p1031_p1, %p1025_p12 }
  0x79   :  { %332 = vmatpush1.bf16.msra.mxu0 %v848_v31  ;;  %373 = vmatpush1.bf16.msra.mxu1 %v849_v32 }
  0x7a   :  { %559 = vmatprep.subr.bf16.mxu0 %v852_v34  ;;  %600 = vmatprep.subr.bf16.mxu1 %v855_v35 }
  0x7c   :  { %350 = vmatmul.mubr.bf16.vlgmr.msra.gmra.mrb[0].mxu0 %v124_v36  ;;  %391 = vmatmul.mubr.bf16.vlgmr.msra.gmra.mrb[0].mxu1 %v124_v36  ;;  %v658_v36 = vrot.slane %v641_v15, %v657_v27 }
  0x7d   :  { %560 = vmatpush1.bf16.msra.mxu0 %v850_v37  ;;  %601 = vmatpush1.bf16.msra.mxu1 %v853_v38  ;;  %v653_v37 = vsub.s32 2, %v644_v13 }
  0x7e   :  { %561 = vmatprep.subr.bf16.mxu0 %v858_v39  ;;  %602 = vmatprep.subr.bf16.mxu1 %v861_v40 }
  0x7f   :  { %591 = vmatprep.mubr.bf16.mxu0 %v1085_v0  ;;  %632 = vmatprep.mubr.bf16.mxu1 %v1085_v0  ;;  %v897_v0 = vld [vmem:[#allocation8 + $0xec] ss:$16 sps:$4 sm:$0xff]   ;;  %v654_v39 = vrot.slane %v641_v15, %v653_v37 }
  0x81   :  { %562 = vmatpush1.bf16.msra.mxu0 %v856_v41  ;;  %603 = vmatpush1.bf16.msra.mxu1 %v859_v42 }
  0x82   :  { %563 = vmatprep.subr.bf16.mxu0 %v864_v43  ;;  %604 = vmatprep.subr.bf16.mxu1 %v867_v44 }
  0x85   :  { %564 = vmatpush1.bf16.msra.mxu0 %v862_v45  ;;  %605 = vmatpush1.bf16.msra.mxu1 %v865_v46 }
  0x86   :  { %565 = vmatprep.subr.bf16.mxu0 %v870_v47  ;;  %606 = vmatprep.subr.bf16.mxu1 %v873_v48  ;;  %v686_v48 = vld [vmem:[#allocation7] sm:$0xff] }
  0x89   :  { %566 = vmatpush1.bf16.msra.mxu0 %v868_v49  ;;  %607 = vmatpush1.bf16.msra.mxu1 %v871_v50 }
  0x8a   :  { %567 = vmatprep.subr.bf16.mxu0 %v876_v51  ;;  %608 = vmatprep.subr.bf16.mxu1 %v879_v52 }
  0x8d   :  { %568 = vmatpush1.bf16.msra.mxu0 %v874_v53  ;;  %609 = vmatpush1.bf16.msra.mxu1 %v877_v54 }
  0x8e   :  { %569 = vmatprep.subr.bf16.mxu0 %v882_v55  ;;  %610 = vmatprep.subr.bf16.mxu1 %v885_v56 }
  0x91   :  { %570 = vmatpush1.bf16.msra.mxu0 %v880_v57  ;;  %611 = vmatpush1.bf16.msra.mxu1 %v883_v58 }
  0x92   :  { %571 = vmatprep.subr.bf16.mxu0 %v888_v59  ;;  %612 = vmatprep.subr.bf16.mxu1 %v891_v60 }
  0x95   :  { %572 = vmatpush1.bf16.msra.mxu0 %v886_v61  ;;  %613 = vmatpush1.bf16.msra.mxu1 %v889_v62 }
  0x96   :  { %573 = vmatprep.subr.bf16.mxu0 %v894_v63  ;;  %614 = vmatprep.subr.bf16.mxu1 %v897_v0 }
  0x99   :  { %574 = vmatpush1.bf16.msra.mxu0 %v892_v1  ;;  %615 = vmatpush1.bf16.msra.mxu1 %v895_v2 }
  0x9c   :  { %592 = vmatmul.mubr.bf16.vlgmr.msra.gmra.mrb[4].mxu0 %v90_v3  ;;  %633 = vmatmul.mubr.bf16.vlgmr.msra.gmra.mrb[4].mxu1 %v90_v3 }
 0x14f   :  { %v351_v4 = vpop.f32.mrb[0].mxu0  ;;  %v392_v5 = vpop.f32.mrb[0].mxu1 }
 0x150   :  { %v353_v6 = vpop.f32.mrb[1].mxu0  ;;  %v394_v7 = vpop.f32.mrb[1].mxu1 }
 0x151   :  { %v355_v8 = vpop.f32.mrb[2].mxu0  ;;  %v396_v9 = vpop.f32.mrb[2].mxu1 }
 0x152   :  { %v356_v10 = vpop.f32.mrb[3].mxu0  ;;  %v397_v11 = vpop.f32.mrb[3].mxu1 }
 0x16f   :  { %v593_v18 = vpop.f32.mrb[4].mxu0  ;;  %v634_v19 = vpop.f32.mrb[4].mxu1 }
 0x170   :  { %v594_v21 = vadd.f32 %v593_v18, %v351_v4  ;;  %v635_v22 = vadd.f32 %v634_v19, %v392_v5  ;;  %v595_v23 = vpop.f32.mrb[5].mxu0  ;;  %v636_v24 = vpop.f32.mrb[5].mxu1 }
 0x171   :  { %v596_v25 = vadd.f32 %v595_v23, %v353_v6  ;;  %v637_v26 = vadd.f32 %v636_v24, %v394_v7  ;;  %v597_v28 = vpop.f32.mrb[6].mxu0  ;;  %v638_v29 = vpop.f32.mrb[6].mxu1 }
 0x172   :  { %v663_v30 = vadd.f32 %v646_v17, %v594_v21  ;;  %v598_v31 = vpop.f32.mrb[7].mxu0  ;;  %v639_v32 = vpop.f32.mrb[7].mxu1  ;;  %v665_v41 = vadd.f32 %v654_v39, %v635_v22 }
 0x173   :  { %v664_v33 = vadd.f32 %v650_v20, %v596_v25  ;;  %v666_v38 = vadd.f32 %v658_v36, %v637_v26 }
 0x174   :  { %v789_v34 = vmul.f32 -1.442695, %v663_v30 }
 0x175   :  { %v790_v35 = vmul.f32 -1.442695, %v664_v33  ;;  %v791_v40 = vmul.f32 -1.442695, %v666_v38 }
 0x176   :  { %898 = vpow2.f32 %v789_v34 }
 0x177   :  { %900 = vpow2.f32 %v790_v35 }
 0x178   :  { %902 = vpow2.f32 %v791_v40 }
 0x179   :  { %904 = vtanh.f32 %v665_v41 }
 0x180   :  { %v899_v42 = vpop.eup %898 }
 0x181   :  { %v901_v43 = vpop.eup %900  ;;  %v670_v44 = vadd.f32 1.0, %v899_v42 }
 0x182   :  { %v676_v45 = vadd.f32 1.0, %v901_v43  ;;  %v903_v46 = vpop.eup %902 }
 0x183   :  { %906 = vrcp.f32 %v670_v44  ;;  %v905_v47 = vpop.eup %904  ;;  %v683_v52 = vadd.f32 1.0, %v903_v46 }
 0x184   :  { %908 = vrcp.f32 %v676_v45 }
 0x185   :  { %910 = vrcp.f32 %v683_v52 }
 0x18d   :  { %v907_v49 = vpop.eup %906 }
 0x18e   :  { %v909_v50 = vpop.eup %908  ;;  %v688_v51 = vmul.f32 %v907_v49, %v905_v47 }
 0x18f   :  { %v687_v53 = vmul.f32 %v909_v50, %v686_v48 }
 0x191   :  { %v689_v54 = vadd.f32 %v688_v51, %v687_v53 }
 0x193   :  { %912 = vtanh.f32 %v689_v54  ;;  %693 = vst [vmem:[#allocation12] sm:$0xff] %v689_v54 }
 0x194   :  { %1035 = shalt.err (!%p1032_p2)
}
 0x195   :  { %s1036_s16 = scalar_lea.hbm %s1239_s7, 128 }
 0x196   :  { %p1037_p3 = scmp.ne.s32.totalorder %s1239_s7, %s1036_s16  ;;  %p1040_p4 = scmp.lt.u32.totalorder %s1036_s16, %s1239_s7 }
 0x198   :  { %p1042_p5 = pnand %p1040_p4, %p1037_p3 }
 0x19a   :  { %1045 = shalt.err (!%p1042_p5)
}
 0x19b   :  { %713 = dma.vmem_to_hbm [thread:$0]  %s711_s23, 128, %s1239_s7, [#allocation13]   ;;  %v911_v55 = vpop.eup %910 }
 0x19c   :  { %s1087_s24 = smov [#allocation11]  }
 0x19d   :  { %s700_s0 = sshll.u32 %s1087_s24, 4  ;;  %v913_v56 = vpop.eup %912  ;;  %s701_s0 = int_to_ptr.vmem [resolvable:$true] %s700_s0 }
 0x19e   :  { %v691_v57 = vmul.f32 %v913_v56, %v911_v55  ;;  %s1046_s25 = scalar_lea.vmem %s701_s0, 128  ;;  %p1051_p7 = scmp.lt.s32.totalorder %s701_s0, %s701_s0 }
 0x19f   :  { %p1047_p6 = scmp.ne.s32.totalorder %s701_s0, %s1046_s25  ;;  %p1052_p8 = scmp.lt.s32.totalorder %s1046_s25, %s1046_s25 }
 0x1a0   :  { %692 = vst [vmem:[#allocation11] sm:$0xff] %v691_v57 }
 0x1a1   :  { %p1053_p9 = por %p1052_p8, %p1051_p7 }
 0x1a3   :  { %p1054_p10 = pnand %p1053_p9, %p1047_p6 }
 0x1a5   :  { %1057 = shalt.err (!%p1054_p10)
}
 0x1a6   :  { %s1058_s29 = scalar_lea.hbm %s1238_s6, 128 }
 0x1a7   :  { %p1059_p11 = scmp.ne.s32.totalorder %s1238_s6, %s1058_s29  ;;  %p1062_p12 = scmp.lt.u32.totalorder %s1058_s29, %s1238_s6 }
 0x1a9   :  { %p1064_p13 = pnand %p1062_p12, %p1059_p11 }
 0x1ab   :  { %1067 = shalt.err (!%p1064_p13)
}
 0x1ac   :  { %703 = dma.vmem_to_hbm [thread:$0]  %s701_s0, 128, %s1238_s6, [#allocation4]  }
 0x1ad   :  { %1074 = dma.done.wait [#allocation4], 128  }
 0x1ae   :  { %1075 = vsyncadd [#allocation4], 4294967168 }
 0x1af   :  { %1076 = dma.done.wait [#allocation13], 128  }
 0x1b0   :  { %1077 = vsyncadd [#allocation13], 4294967168 }
 0x1b1   :  { %720 = vsyncpa [#allocation3], 1 }
 0x1b2   :  { %721 = vsyncpa [#allocation6], 1 }
 0x1b3   :  { %722 = vsyncpa [#allocation9], 1 }
 0x1b4   :  { %723 = vsyncpa [#allocation4], 1 }
 0x1b5   :  { %724 = vsyncpa [#allocation13], 1 }

</bundles_post_ra>
